<compile_context>
chip_gen: v6e
topology: v6e:2x2x1
jax: 0.10.0
libtpu: 0.0.40
codegen_flags: <defaults>
</compile_context>

<pallas_src>
import math
from functools import partial

import jax
import jax.numpy as jnp
from jax.experimental import pallas as pl
from jax.experimental.pallas import tpu as pltpu

# --- fixed module constants (from LogisticUtahChillModule, requires_grad=False) ---
ALPHA1, BETA1, OMEGA1 = 5.0, 2.0, 1.0
ALPHA2, BETA2, OMEGA2 = 1.0, 14.0, -2.0

# Deterministic stand-ins for TorchDatasetWrapper.normalize_temperature(revert=True):
#   revert: ts = x * TEMP_STD + TEMP_MEAN
# TODO(synk): exact mean/std constants live in TorchDatasetWrapper; synthetic values used here.
TEMP_MEAN = 10.0
TEMP_STD = 10.0

# tanh-form sigmoid with denormalization folded in (all compile-time constants):
#   OMEGA*sigmoid(ALPHA*(x*STD + MEAN - BETA))
#     = OMEGA/2 + (OMEGA/2)*tanh( (ALPHA*STD/2)*x + ALPHA*(MEAN-BETA)/2 )
_A1 = 0.5 * ALPHA1 * TEMP_STD
_B1 = 0.5 * ALPHA1 * (TEMP_MEAN - BETA1)
_C1 = 0.5 * OMEGA1
_A2 = 0.5 * ALPHA2 * TEMP_STD
_B2 = 0.5 * ALPHA2 * (TEMP_MEAN - BETA2)
_C2 = 0.5 * OMEGA2
_C0 = 0.5 * (OMEGA1 + OMEGA2)          # constant term, added after the mean


def _utah_chill_kernel(x_ref, r_ref, o_ref):
    # x_ref: (TR, L) block, L = G*H lanes (multiple of 128) -> full VPU/EUP width.
    # r_ref: (L, G) constant block-diagonal (1/H) segmented-mean matrix (MXU).
    # o_ref: (TR, G) reduced output block.
    x = x_ref[...].astype(jnp.float32)
    g = _C1 * jnp.tanh(_A1 * x + _B1) + _C2 * jnp.tanh(_A2 * x + _B2)
    m = jnp.dot(g, r_ref[...], preferred_element_type=jnp.float32) + _C0
    o_ref[...] = jnp.maximum(m, 0.0).astype(o_ref.dtype)


def _choose_rows(mr: int, target_rows: int) -> int:
    """Rows per block for the (MR, L) slab."""
    if mr <= max(target_rows, 8):
        return mr                         # single full-array block, grid=(1,)
    steps = pl.cdiv(mr, target_rows)
    if steps % 2:                         # v7x: 2 TCs share the "parallel" axis
        steps += 1
    tr = pl.cdiv(mr, steps)
    return max(8, ((tr + 7) // 8) * 8)    # sublane multiple of 8


@partial(jax.jit, static_argnames=("target_rows",))
def logistic_utah_chill_forward(temperature_normalized: jnp.ndarray,
                                *, target_rows: int = 2048) -> jnp.ndarray:
    """temperature_normalized: (B, S, H) normalized temps -> returns (B, S)."""
    B, S, H = temperature_normalized.shape
    M = B * S
    G = 128 // math.gcd(H, 128)           # smallest group so (G*H) % 128 == 0
    L = G * H

    x2d = temperature_normalized.reshape(M, H)     # free row-major view
    pad_m = (-M) % G
    if pad_m:
        # TODO(synk): misaligned M (M % G != 0) costs one extra HBM copy;
        # typical aligned shapes take the zero-copy path below.
        x2d = jnp.pad(x2d, ((0, pad_m), (0, 0)))
    Mp = M + pad_m
    MR = Mp // G
    xs = x2d.reshape(MR, L)                        # free row-major regroup

    # Constant segmented-mean matrix: red[k, j] = 1/H if k // H == j else 0.
    seg = (jnp.arange(L) // H)[:, None] == jnp.arange(G)[None, :]
    red = jnp.where(seg, jnp.float32(1.0 / H), jnp.float32(0.0))

    tr = _choose_rows(MR, target_rows)
    grid = (pl.cdiv(MR, tr),)

    out = pl.pallas_call(
        _utah_chill_kernel,
        out_shape=jax.ShapeDtypeStruct((MR, G), temperature_normalized.dtype),
        grid_spec=pltpu.PrefetchScalarGridSpec(
            num_scalar_prefetch=0,
            grid=grid,
            in_specs=[pl.BlockSpec((tr, L), lambda i: (i, 0)),
                      pl.BlockSpec((L, G), lambda i: (0, 0))],   # resident constant
            out_specs=pl.BlockSpec((tr, G), lambda i: (i, 0)),
        ),
        compiler_params=pltpu.CompilerParams(
            dimension_semantics=("parallel",),
            vmem_limit_bytes=32 * 1024 * 1024,
        ),
    )(xs, red)

    out_flat = out.reshape(Mp)
    if pad_m:
        out_flat = out_flat[:M]
    return out_flat.reshape(B, S)


def _reference(temperature_normalized: jnp.ndarray) -> jnp.ndarray:
    ts = temperature_normalized.astype(jnp.float32) * TEMP_STD + TEMP_MEAN
    f1 = OMEGA1 / (1.0 + jnp.exp(-ALPHA1 * (ts - BETA1)))
    f2 = OMEGA2 / (1.0 + jnp.exp(-ALPHA2 * (ts - BETA2)))
    return jnp.maximum(jnp.mean(f1 + f2, axis=-1), 0.0)


if __name__ == "__main__":
    key = jax.random.PRNGKey(0)
    # xs = {'temperature': <normalized temps>}, shape (batch=2, season_len=16, hours=24)
    temperature = jax.random.normal(key, (2, 16, 24), dtype=jnp.float32)
    xs = {"temperature": temperature}

    out = jax.block_until_ready(logistic_utah_chill_forward(xs["temperature"]))
    ref = _reference(xs["temperature"])
    assert out.shape == (2, 16), out.shape
    assert jnp.allclose(out, ref, atol=1e-5, rtol=1e-5), "mismatch vs reference"

    # Misaligned M (300 % 16 != 0) -> exercises the (rare) pad fallback path.
    t2 = jax.random.normal(jax.random.PRNGKey(1), (3, 100, 24), dtype=jnp.float32)
    out2 = jax.block_until_ready(logistic_utah_chill_forward(t2))
    ref2 = _reference(t2)
    assert out2.shape == (3, 100), out2.shape
    assert jnp.allclose(out2, ref2, atol=1e-5, rtol=1e-5), "mismatch (misaligned M)"

    # Tiny target_rows -> multi-block grid with a ragged last block (OOB rows).
    out3 = jax.block_until_ready(logistic_utah_chill_forward(t2, target_rows=8))
    assert out3.shape == (3, 100), out3.shape
    assert jnp.allclose(out3, ref2, atol=1e-5, rtol=1e-5), "mismatch (tiled/ragged)"

    print("KERNEL_OK")
</pallas_src>

<mosaic_0001>
module attributes {stable_mosaic.version = 11 : i64} {
  func.func @_utah_chill_kernel(%arg0: i32, %arg1: memref<2x384xf32, #tpu.memory_space<vmem>>, %arg2: memref<384x16xf32, #tpu.memory_space<vmem>>, %arg3: memref<2x16xf32, #tpu.memory_space<vmem>>) attributes {dimension_semantics = [#tpu.dimension_semantics<parallel>], iteration_bounds = array<i64: 1>, scalar_prefetch = 0 : i64, scratch_operands = 0 : i64, tpu.core_type = #tpu.core_type<tc>, window_params = [{transform_indices = @transform_0, window_bounds = array<i64: 2, 384>}, {pipeline_mode = #tpu.pipeline_mode<synchronous>, transform_indices = @transform_1, window_bounds = array<i64: 384, 16>}, {transform_indices = @transform_2, window_bounds = array<i64: 2, 16>}]} {
    %c0 = arith.constant 0 : index
    %c0_0 = arith.constant 0 : index
    %0 = vector.load %arg1[%c0, %c0_0] : memref<2x384xf32, #tpu.memory_space<vmem>>, vector<2x384xf32>
    %cst = arith.constant 2.500000e+01 : f32
    %1 = vector.broadcast %cst : f32 to vector<2x384xf32>
    %2 = arith.mulf %1, %0 : vector<2x384xf32>
    %cst_1 = arith.constant 2.000000e+01 : f32
    %3 = vector.broadcast %cst_1 : f32 to vector<2x384xf32>
    %4 = arith.addf %2, %3 : vector<2x384xf32>
    %5 = math.tanh %4 : vector<2x384xf32>
    %cst_2 = arith.constant 5.000000e-01 : f32
    %6 = vector.broadcast %cst_2 : f32 to vector<2x384xf32>
    %7 = arith.mulf %6, %5 : vector<2x384xf32>
    %cst_3 = arith.constant 5.000000e+00 : f32
    %8 = vector.broadcast %cst_3 : f32 to vector<2x384xf32>
    %9 = arith.mulf %8, %0 : vector<2x384xf32>
    %cst_4 = arith.constant -2.000000e+00 : f32
    %10 = vector.broadcast %cst_4 : f32 to vector<2x384xf32>
    %11 = arith.addf %9, %10 : vector<2x384xf32>
    %12 = math.tanh %11 : vector<2x384xf32>
    %cst_5 = arith.constant -1.000000e+00 : f32
    %13 = vector.broadcast %cst_5 : f32 to vector<2x384xf32>
    %14 = arith.mulf %13, %12 : vector<2x384xf32>
    %15 = arith.addf %7, %14 : vector<2x384xf32>
    %c0_6 = arith.constant 0 : index
    %c0_7 = arith.constant 0 : index
    %16 = vector.load %arg2[%c0_6, %c0_7] : memref<384x16xf32, #tpu.memory_space<vmem>>, vector<384x16xf32>
    %cst_8 = arith.constant dense<0.000000e+00> : vector<2x16xf32>
    %17 = tpu.matmul %15, %16, %cst_8 {dimension_numbers = #tpu.dot_dimension_numbers<[1], [0], [0], [1], [0, 0, 1, 1], [], []>} : vector<2x384xf32>, vector<384x16xf32>, vector<2x16xf32> -> vector<2x16xf32>
    %cst_9 = arith.constant -5.000000e-01 : f32
    %18 = vector.broadcast %cst_9 : f32 to vector<2x16xf32>
    %19 = arith.addf %17, %18 : vector<2x16xf32>
    %cst_10 = arith.constant 0.000000e+00 : f32
    %20 = vector.broadcast %cst_10 : f32 to vector<2x16xf32>
    %21 = arith.maximumf %19, %20 : vector<2x16xf32>
    %c0_11 = arith.constant 0 : index
    %c0_12 = arith.constant 0 : index
    %22 = vector.load %arg3[%c0_11, %c0_12] : memref<2x16xf32, #tpu.memory_space<vmem>>, vector<2x16xf32>
    tpu.vector_store %arg3[%c0_11, %c0_12], %21 {strides = array<i32>} : memref<2x16xf32, #tpu.memory_space<vmem>>, vector<2x16xf32>,
    return
  }
  func.func @transform_0(%arg0: i32) -> (i32, i32) {
    %c0_i32 = arith.constant 0 : i32
    %c0_i32_0 = arith.constant 0 : i32
    return %arg0, %c0_i32 : i32, i32
  }
  func.func @transform_1(%arg0: i32) -> (i32, i32) {
    %c0_i32 = arith.constant 0 : i32
    %c0_i32_0 = arith.constant 0 : i32
    %c0_i32_1 = arith.constant 0 : i32
    return %c0_i32, %c0_i32_0 : i32, i32
  }
  func.func @transform_2(%arg0: i32) -> (i32, i32) {
    %c0_i32 = arith.constant 0 : i32
    %c0_i32_0 = arith.constant 0 : i32
    return %arg0, %c0_i32 : i32, i32
  }
}

</mosaic_0001>

<bundles_post_ra>
// kernel: logistic_utah_chill_forward.1
= control target key start
LH: loop header
LB: loop body
LE: loop exit
PB: predicated region body
PF: predicated region fallthrough
CT: control target
= control target key end

     0   :  { %v364_v4 = vmov 0.0   ;;  %vm365_vm0 = vmmov 0   ;;  %s550_s0 = inlined_call_operand.vmem [shape: f32[2,384], index: 0, kind: input, shape index: {}]   ;;  %s551_s1 = inlined_call_operand.vmem [shape: f32[384,16], index: 1, kind: input, shape index: {}]   ;;  %s552_s2 = inlined_call_operand.hbm [shape: f32[2,16], index: 2, kind: output, shape index: {}]  }
   0x1   :  { %v53_v0 = vld [vmem:[%s551_s1 + $0xf8] sm:$0xff]  ;;  %v52_v2 = vld [vmem:[%s551_s1 + $0xf0] sm:$0xff]  ;;  %299 = vmatprep.subr.mxu1 %v364_v4  ;;  %v51_v5 = vld [vmem:[%s551_s1 + $0xe8] sm:$0xff]  ;;  %331 = vmatprep.mubr.msk.f32.mxu1 %vm365_vm0, %v364_v4 }
   0x2   :  { %v37_v1 = vld [vmem:[%s551_s1 + $0x78] sm:$0xff]  ;;  %247 = vmatprep.subr.mxu0 %v53_v0  ;;  %v36_v3 = vld [vmem:[%s551_s1 + $0x70] sm:$0xff]  ;;  %v35_v7 = vld [vmem:[%s551_s1 + $0x68] sm:$0xff] }
   0x3   :  { %248 = vmatpush3.msra.mxu0 %v37_v1  ;;  %v69_v6 = vld [vmem:[%s551_s1 + $0x178] sm:$0xff]  ;;  %v68_v8 = vld [vmem:[%s551_s1 + $0x170] sm:$0xff]  ;;  %v50_v9 = vld [vmem:[%s551_s1 + $0xe0] sm:$0xff] }
   0x4   :  { %249 = vmatprep.subr.mxu0 %v52_v2  ;;  %300 = vmatpush3.msra.mxu1 %v69_v6  ;;  %v67_v10 = vld [vmem:[%s551_s1 + $0x168] sm:$0xff]  ;;  %v34_v11 = vld [vmem:[%s551_s1 + $0x60] sm:$0xff]  ;;  %v49_v12 = vld [vmem:[%s551_s1 + $0xd8] sm:$0xff] }
   0x5   :  { %250 = vmatpush3.msra.mxu0 %v36_v3  ;;  %301 = vmatprep.subr.mxu1 %v364_v4  ;;  %v66_v13 = vld [vmem:[%s551_s1 + $0x160] sm:$0xff]  ;;  %v33_v14 = vld [vmem:[%s551_s1 + $0x58] sm:$0xff]  ;;  %v48_v15 = vld [vmem:[%s551_s1 + $0xd0] sm:$0xff] }
   0x6   :  { %251 = vmatprep.subr.mxu0 %v51_v5  ;;  %302 = vmatpush3.msra.mxu1 %v68_v8  ;;  %v65_v16 = vld [vmem:[%s551_s1 + $0x158] sm:$0xff]  ;;  %v32_v17 = vld [vmem:[%s551_s1 + $0x50] sm:$0xff]  ;;  %v47_v18 = vld [vmem:[%s551_s1 + $0xc8] sm:$0xff] }
   0x7   :  { %252 = vmatpush3.msra.mxu0 %v35_v7  ;;  %303 = vmatprep.subr.mxu1 %v364_v4  ;;  %v64_v19 = vld [vmem:[%s551_s1 + $0x150] sm:$0xff]  ;;  %v31_v20 = vld [vmem:[%s551_s1 + $0x48] sm:$0xff]  ;;  %v46_v21 = vld [vmem:[%s551_s1 + $0xc0] sm:$0xff] }
   0x8   :  { %253 = vmatprep.subr.mxu0 %v50_v9  ;;  %304 = vmatpush3.msra.mxu1 %v67_v10  ;;  %v63_v22 = vld [vmem:[%s551_s1 + $0x148] sm:$0xff]  ;;  %v30_v23 = vld [vmem:[%s551_s1 + $0x40] sm:$0xff]  ;;  %v45_v24 = vld [vmem:[%s551_s1 + $0xb8] sm:$0xff] }
   0x9   :  { %254 = vmatpush3.msra.mxu0 %v34_v11  ;;  %305 = vmatprep.subr.mxu1 %v364_v4  ;;  %v62_v25 = vld [vmem:[%s551_s1 + $0x140] sm:$0xff]  ;;  %v29_v26 = vld [vmem:[%s551_s1 + $0x38] sm:$0xff]  ;;  %v44_v28 = vld [vmem:[%s551_s1 + $0xb0] sm:$0xff] }
   0xa   :  { %255 = vmatprep.subr.mxu0 %v49_v12  ;;  %306 = vmatpush3.msra.mxu1 %v66_v13  ;;  %v12_v27 = vld [vmem:[%s550_s0] sm:$0x3f]  ;;  %v61_v29 = vld [vmem:[%s551_s1 + $0x138] sm:$0xff] }
   0xb   :  { %256 = vmatpush3.msra.mxu0 %v33_v14  ;;  %307 = vmatprep.subr.mxu1 %v364_v4  ;;  %v13_v30 = vmul.f32 25.0, %v12_v27  ;;  %v17_v31 = vmul.f32 5.0, %v12_v27 }
   0xc   :  { %257 = vmatprep.subr.mxu0 %v48_v15  ;;  %308 = vmatpush3.msra.mxu1 %v65_v16 }
   0xd   :  { %258 = vmatpush3.msra.mxu0 %v32_v17  ;;  %309 = vmatprep.subr.mxu1 %v364_v4 }
   0xe   :  { %259 = vmatprep.subr.mxu0 %v47_v18  ;;  %310 = vmatpush3.msra.mxu1 %v64_v19 }
   0xf   :  { %260 = vmatpush3.msra.mxu0 %v31_v20  ;;  %311 = vmatprep.subr.mxu1 %v364_v4 }
  0x10   :  { %261 = vmatprep.subr.mxu0 %v46_v21  ;;  %312 = vmatpush3.msra.mxu1 %v63_v22 }
  0x11   :  { %262 = vmatpush3.msra.mxu0 %v30_v23  ;;  %313 = vmatprep.subr.mxu1 %v364_v4 }
  0x12   :  { %7 = vsyncpa [#allocation3], 0  ;;  %263 = vmatprep.subr.mxu0 %v45_v24  ;;  %v28_v32 = vld [vmem:[%s551_s1 + $0x30] sm:$0xff]  ;;  %314 = vmatpush3.msra.mxu1 %v62_v25  ;;  %v43_v33 = vld [vmem:[%s551_s1 + $0xa8] sm:$0xff]  ;;  %v14_v35 = vadd.f32 20.0, %v13_v30  ;;  %v18_v36 = vadd.f32 -2.0, %v17_v31  ;;  %v75_v52 = vlaneseq }
  0x13   :  { %264 = vmatpush3.msra.mxu0 %v29_v26  ;;  %315 = vmatprep.subr.mxu1 %v364_v4  ;;  %v60_v34 = vld [vmem:[%s551_s1 + $0x130] sm:$0xff]  ;;  %v27_v37 = vld [vmem:[%s551_s1 + $0x28] sm:$0xff]  ;;  %v42_v38 = vld [vmem:[%s551_s1 + $0xa0] sm:$0xff]  ;;  %v366_v50 = vmov 1983009808   ;;  %vm231_vm1 = vcmask 123904  }
  0x14   :  { %265 = vmatprep.subr.mxu0 %v44_v28  ;;  %316 = vmatpush3.msra.mxu1 %v61_v29  ;;  %v59_v39 = vld [vmem:[%s551_s1 + $0x128] sm:$0xff]  ;;  %338 = vtanh.f32 %v14_v35  ;;  %v26_v40 = vld [vmem:[%s551_s1 + $0x20] sm:$0xff]  ;;  %v41_v41 = vld [vmem:[%s551_s1 + $0x98] sm:$0xff]  ;;  %v73_v51 = vunpack.c.l.s4 %v366_v50  ;;  %v76_v58 = vshrl.u32 %v75_v52, 7 }
  0x15   :  { %266 = vmatpush3.msra.mxu0 %v28_v32  ;;  %317 = vmatprep.subr.mxu1 %v364_v4  ;;  %340 = vtanh.f32 %v18_v36  ;;  %v58_v42 = vld [vmem:[%s551_s1 + $0x120] sm:$0xff]  ;;  %v25_v43 = vld [vmem:[%s551_s1 + $0x18] sm:$0xff]  ;;  %v40_v44 = vld [vmem:[%s551_s1 + $0x90] sm:$0xff] }
  0x16   :  { %267 = vmatprep.subr.mxu0 %v43_v33  ;;  %318 = vmatpush3.msra.mxu1 %v60_v34  ;;  %v57_v45 = vld [vmem:[%s551_s1 + $0x118] sm:$0xff]  ;;  %v24_v46 = vld [vmem:[%s551_s1 + $0x10] sm:$0xff]  ;;  %v39_v47 = vld [vmem:[%s551_s1 + $0x88] sm:$0xff]  ;;  %v74_v57 = vunpack.c.0.s8 %v73_v51 }
  0x17   :  { %268 = vmatpush3.msra.mxu0 %v27_v37  ;;  %319 = vmatprep.subr.mxu1 %v364_v4  ;;  %v56_v48 = vld [vmem:[%s551_s1 + $0x110] sm:$0xff]  ;;  %v23_v49 = vld [vmem:[%s551_s1 + $0x8] sm:$0xff]  ;;  %v38_v53 = vld [vmem:[%s551_s1 + $0x80] sm:$0xff] }
  0x18   :  { %269 = vmatprep.subr.mxu0 %v42_v38  ;;  %320 = vmatpush3.msra.mxu1 %v59_v39  ;;  %v55_v54 = vld [vmem:[%s551_s1 + $0x108] sm:$0xff]  ;;  %v22_v55 = vld [vmem:[%s551_s1] sm:$0xff]  ;;  %v77_v63 = vsub.s32 %v74_v57, %v76_v58 }
  0x19   :  { %270 = vmatpush3.msra.mxu0 %v26_v40  ;;  %321 = vmatprep.subr.mxu1 %v364_v4  ;;  %v54_v56 = vld [vmem:[%s551_s1 + $0x100] sm:$0xff]  ;;  %s367_s1 = smov [#allocation2]  }
  0x1a   :  { %271 = vmatprep.subr.mxu0 %v41_v41  ;;  %322 = vmatpush3.msra.mxu1 %v58_v42  ;;  %s239_s21 = sshll.u32 %s367_s1, 4  ;;  %s240_s21 = int_to_ptr.vmem [resolvable:$true] %s239_s21 }
  0x1b   :  { %272 = vmatpush3.msra.mxu0 %v25_v43  ;;  %323 = vmatprep.subr.mxu1 %v364_v4  ;;  %s342_s22 = scalar_lea.vmem %s240_s21, 32  ;;  %p347_p1 = scmp.lt.s32.totalorder %s240_s21, %s240_s21 }
  0x1c   :  { %273 = vmatprep.subr.mxu0 %v40_v44  ;;  %324 = vmatpush3.msra.mxu1 %v57_v45  ;;  %p343_p0 = scmp.ne.s32.totalorder %s240_s21, %s342_s22  ;;  %p348_p2 = scmp.lt.s32.totalorder %s342_s22, %s342_s22 }
  0x1d   :  { %274 = vmatpush3.msra.mxu0 %v24_v46  ;;  %325 = vmatprep.subr.mxu1 %v364_v4 }
  0x1e   :  { %275 = vmatprep.subr.mxu0 %v39_v47  ;;  %326 = vmatpush3.msra.mxu1 %v56_v48  ;;  %p349_p3 = por %p348_p2, %p347_p1 }
  0x1f   :  { %276 = vmatpush3.msra.mxu0 %v23_v49  ;;  %327 = vmatprep.subr.mxu1 %v364_v4 }
  0x20   :  { %277 = vmatprep.subr.mxu0 %v38_v53  ;;  %328 = vmatpush3.msra.mxu1 %v55_v54  ;;  %p350_p4 = pnand %p349_p3, %p343_p0 }
  0x21   :  { %278 = vmatpush3.msra.mxu0 %v22_v55  ;;  %329 = vmatprep.subr.mxu1 %v364_v4  ;;  %v339_v59 = vpop.eup %338 }
  0x22   :  { %330 = vmatpush3.msra.mxu1 %v54_v56  ;;  %v341_v60 = vpop.eup %340  ;;  %v16_v61 = vmul.f32 0.5, %v339_v59 }
  0x23   :  { %v20_v62 = vmul.f32 -1.0, %v341_v60 }
  0x25   :  { %v21_v0 = vadd.f32 %v20_v62, %v16_v61 }
  0x27   :  { %v78_v1 = vrot.slane %v21_v0, %v77_v63  ;;  %v71_v2 = vcombine.high %v21_v0, %v21_v0 }
  0x29   :  { %v86_v3 = vcombine.high %v78_v1, %v78_v1  ;;  %v85_v5 = vrot.slane %v71_v2, %v77_v63 }
  0x2b   :  { %154 = vmatprep.mubr.f32.mxu0 %v86_v3  ;;  %332 = vmatmul.mubr.f32.vlgmr.msra.gmra.mxu1 %v85_v5 }
  0x2c   :  { %155 = vmatmul.mubr.f32.vlgmr.msra.gmra.mxu0 %v78_v1 }
  0xeb   :  { %v226_v6 = vpop.f32.mrf.mxu1 }
  0xec   :  { %v279_v7 = vpop.f32.mrf.mxu0 }
  0xed   :  { %v333_v8 = vpop.f32.mrf.mxu1 }
  0xee   :  { %v280_v9 = vpop.f32.mrf.mxu0 }
  0xef   :  { %v281_v10 = vadd.f32 %v280_v9, %v279_v7 }
  0xf1   :  { %v157_v4 = vadd.f32 -0.5, %v281_v10 }
  0xf3   :  { %v227_v11 = vadd.f32 %v226_v6, %v157_v4 }
  0xf5   :  { %v230_v12 = vmax.f32 %v227_v11, 0.0 }
  0xf7   :  { %232 = vst.msk [vmem:[#allocation2] sm:$0x3] %vm231_vm1, %v230_v12 }
  0xf8   :  { %353 = shalt.err (!%p350_p4)
}
  0xf9   :  { %242 = dma.vmem_to_hbm [thread:$0]  %s240_s21, 32, %s552_s2, [#allocation3]  }
  0xfa   :  { %362 = dma.done.wait [#allocation3], 32  }
  0xfb   :  { %363 = vsyncadd [#allocation3], 4294967264 }
  0xfc   :  { %246 = vsyncpa [#allocation3], 1 }

</bundles_post_ra>
